<compile_context>
chip_gen: v5e
topology: v5e:2x2
jax: 0.10.0
libtpu: 0.0.40
codegen_flags: <defaults>
</compile_context>

<pallas_src>
import functools
import numpy as np

import jax
import jax.numpy as jnp
from jax.experimental import pallas as pl
from jax.experimental.pallas import tpu as pltpu

MAX_ROW_TILE = 256
_CP = pltpu.CompilerParams(dimension_semantics=("parallel",),
                           vmem_limit_bytes=32 * 1024 * 1024)


def _round_up(x, m):
    return ((x + m - 1) // m) * m


def _row_tile_and_pad(m):
    """Row tile choice: >=2 grid steps when worthwhile (v7x megacore), tile a
    multiple of 16 (bf16 packing), prefer tiles that divide M (no pad copies)."""
    if m < 32:
        tm = _round_up(m, 8)                       # single full block
    elif m <= 2 * MAX_ROW_TILE:
        tm = _round_up((m + 1) // 2, 16)           # exactly 2 grid steps
    else:
        tm = MAX_ROW_TILE
        if m % 16 == 0:
            for cand in range(MAX_ROW_TILE, MAX_ROW_TILE // 2 - 1, -16):
                if m % cand == 0:                  # exact divisor -> no padding
                    tm = cand
                    break
    mp = _round_up(m, tm)
    return tm, mp


def _pad_rows(x, mp):
    m = x.shape[0]
    return x if mp == m else jnp.pad(x, ((0, mp - m), (0, 0)))


# ----------------------------- Pallas kernels ------------------------------

def _linear_kernel(x_ref, w_ref, b_ref, o_ref, *, act):
    acc = jnp.dot(x_ref[...], w_ref[...], preferred_element_type=jnp.float32)
    acc = acc + b_ref[...]
    if act == "relu":
        acc = jnp.maximum(acc, 0.0)
    o_ref[...] = acc.astype(o_ref.dtype)


def _mlp_kernel(x_ref, *rest, n_layers, has_extra):
    """Fused MLP (ReLU between layers, none at end); optional extra linear head
    computed from the same input row tile (dec_score_head fusion)."""
    h = x_ref[...]                                   # bf16
    acc = None
    for l in range(n_layers):
        w_ref = rest[2 * l]
        b_ref = rest[2 * l + 1]
        acc = jnp.dot(h, w_ref[...], preferred_element_type=jnp.float32) + b_ref[...]
        if l < n_layers - 1:
            h = jnp.maximum(acc, 0.0).astype(jnp.bfloat16)
    if has_extra:
        we_ref = rest[2 * n_layers]
        be_ref = rest[2 * n_layers + 1]
        o_ref = rest[2 * n_layers + 2]
        e_ref = rest[2 * n_layers + 3]
        e = jnp.dot(x_ref[...], we_ref[...], preferred_element_type=jnp.float32) + be_ref[...]
        e_ref[...] = e.astype(e_ref.dtype)
    else:
        o_ref = rest[2 * n_layers]
    o_ref[...] = acc.astype(o_ref.dtype)


def _ln_epilogue(y, g, b, eps):
    mean = jnp.mean(y, axis=-1, keepdims=True)
    yc = y - mean
    var = jnp.mean(yc * yc, axis=-1, keepdims=True)
    return yc * jax.lax.rsqrt(var + eps) * g + b


def _linear_ln_kernel(x_ref, w_ref, b_ref, g_ref, bb_ref, o_ref, *, eps):
    """LN(x @ w + b)."""
    y = jnp.dot(x_ref[...], w_ref[...], preferred_element_type=jnp.float32) + b_ref[...]
    o_ref[...] = _ln_epilogue(y, g_ref[...], bb_ref[...], eps).astype(o_ref.dtype)


def _linear_ln_res_kernel(x_ref, w_ref, b_ref, r_ref, g_ref, bb_ref, o_ref, *, eps):
    """LN(residual + x @ w + b) — fused projection + residual add + LayerNorm."""
    y = jnp.dot(x_ref[...], w_ref[...], preferred_element_type=jnp.float32) + b_ref[...]
    y = y + r_ref[...]
    o_ref[...] = _ln_epilogue(y, g_ref[...], bb_ref[...], eps).astype(o_ref.dtype)


def _ffn_ln_kernel(x_ref, w1_ref, b1_ref, w2_ref, b2_ref, g_ref, bb_ref, o_ref, *, eps):
    """LN(x + lin2(relu(lin1(x)))) — whole FFN block in one kernel."""
    x = x_ref[...]                                   # f32 (exact residual)
    xb = x.astype(jnp.bfloat16)
    h = jnp.dot(xb, w1_ref[...], preferred_element_type=jnp.float32) + b1_ref[...]
    h = jnp.maximum(h, 0.0).astype(jnp.bfloat16)
    y = jnp.dot(h, w2_ref[...], preferred_element_type=jnp.float32) + b2_ref[...]
    y = y + x
    o_ref[...] = _ln_epilogue(y, g_ref[...], bb_ref[...], eps).astype(o_ref.dtype)


def _qkv_qpe_kernel(tgt_ref, ref_ref, w0_ref, b0_ref, w1_ref, b1_ref,
                    wqk_ref, bqk_ref, wv_ref, bv_ref,
                    qk_ref, v_ref, qpe_ref):
    """query_pos_head MLP + fused QK projection + V projection in one kernel.

    qpe = MLP(ref_points);  qk = (tgt + qpe) @ Wqk + bqk;  v = tgt @ Wv + bv.
    """
    r = ref_ref[...].astype(jnp.bfloat16)            # (tm, 4)
    h = jnp.dot(r, w0_ref[...], preferred_element_type=jnp.float32) + b0_ref[...]
    h = jnp.maximum(h, 0.0).astype(jnp.bfloat16)
    qpe = jnp.dot(h, w1_ref[...], preferred_element_type=jnp.float32) + b1_ref[...]
    tgt = tgt_ref[...]                               # (tm, E) f32
    q_in = (tgt + qpe).astype(jnp.bfloat16)
    qk = jnp.dot(q_in, wqk_ref[...], preferred_element_type=jnp.float32) + bqk_ref[...]
    v = jnp.dot(tgt.astype(jnp.bfloat16), wv_ref[...],
                preferred_element_type=jnp.float32) + bv_ref[...]
    qk_ref[...] = qk.astype(qk_ref.dtype)
    v_ref[...] = v.astype(v_ref.dtype)
    qpe_ref[...] = qpe


def _sdpa_kernel(q_ref, k_ref, v_ref, o_ref, *, scale, num_heads, head_dim):
    """All heads of one batch element; per-head results assembled in-register and
    written with a single lane-dense store of the (Lq, E) block."""
    outs = []
    for h in range(num_heads):
        lo = h * head_dim
        hi = lo + head_dim
        q = q_ref[0, :, lo:hi]
        k = k_ref[0, :, lo:hi]
        v = v_ref[0, :, lo:hi]
        s = jax.lax.dot_general(q, k, (((1,), (1,)), ((), ())),
                                preferred_element_type=jnp.float32) * scale
        m = jnp.max(s, axis=-1, keepdims=True)
        p = jnp.exp(s - m)
        p = p * pl.reciprocal(jnp.sum(p, axis=-1, keepdims=True), approx=True)
        outs.append(jnp.dot(p.astype(jnp.bfloat16), v, preferred_element_type=jnp.float32))
    o_ref[0, :, :] = jnp.concatenate(outs, axis=-1).astype(o_ref.dtype)


# ------------------------------ Pallas wrappers -----------------------------

def pallas_linear(x, w, b, act="none", out_dtype=jnp.float32):
    """y = act(x @ w + b). bf16 MXU operands, f32 accumulate, f32 bias."""
    lead = x.shape[:-1]
    K = x.shape[-1]
    N = w.shape[-1]
    x2 = x.reshape(-1, K).astype(jnp.bfloat16)
    M = x2.shape[0]
    tm, Mp = _row_tile_and_pad(M)
    x2 = _pad_rows(x2, Mp)
    out = pl.pallas_call(
        functools.partial(_linear_kernel, act=act),
        out_shape=jax.ShapeDtypeStruct((Mp, N), out_dtype),
        grid=(Mp // tm,),
        in_specs=[
            pl.BlockSpec((tm, K), lambda i: (i, 0)),
            pl.BlockSpec((K, N), lambda i: (0, 0)),
            pl.BlockSpec((1, N), lambda i: (0, 0)),
        ],
        out_specs=pl.BlockSpec((tm, N), lambda i: (i, 0)),
        compiler_params=_CP,
    )(x2, w.astype(jnp.bfloat16), b.reshape(1, N).astype(jnp.float32))
    return out[:M].reshape(*lead, N)


def pallas_mlp(layers, x, out_dtype=jnp.float32, extra=None, extra_dtype=jnp.float32):
    """Fused MLP (ReLU between layers) in one kernel; optional fused extra head."""
    lead = x.shape[:-1]
    K0 = x.shape[-1]
    x2 = x.reshape(-1, K0).astype(jnp.bfloat16)
    M = x2.shape[0]
    tm, Mp = _row_tile_and_pad(M)
    x2 = _pad_rows(x2, Mp)
    n = len(layers)
    args = [x2]
    in_specs = [pl.BlockSpec((tm, K0), lambda i: (i, 0))]
    for lp in layers:
        K, N = lp["w"].shape
        args.append(lp["w"].astype(jnp.bfloat16))
        args.append(lp["b"].reshape(1, N).astype(jnp.float32))
        in_specs.append(pl.BlockSpec((K, N), lambda i: (0, 0)))
        in_specs.append(pl.BlockSpec((1, N), lambda i: (0, 0)))
    Nout = layers[-1]["w"].shape[-1]
    if extra is None:
        out_shape = jax.ShapeDtypeStruct((Mp, Nout), out_dtype)
        out_specs = pl.BlockSpec((tm, Nout), lambda i: (i, 0))
    else:
        we, be = extra
        Ne = we.shape[-1]
        args.append(we.astype(jnp.bfloat16))
        args.append(be.reshape(1, Ne).astype(jnp.float32))
        in_specs.append(pl.BlockSpec((K0, Ne), lambda i: (0, 0)))
        in_specs.append(pl.BlockSpec((1, Ne), lambda i: (0, 0)))
        out_shape = (jax.ShapeDtypeStruct((Mp, Nout), out_dtype),
                     jax.ShapeDtypeStruct((Mp, Ne), extra_dtype))
        out_specs = (pl.BlockSpec((tm, Nout), lambda i: (i, 0)),
                     pl.BlockSpec((tm, Ne), lambda i: (i, 0)))
    out = pl.pallas_call(
        functools.partial(_mlp_kernel, n_layers=n, has_extra=extra is not None),
        out_shape=out_shape,
        grid=(Mp // tm,),
        in_specs=in_specs,
        out_specs=out_specs,
        compiler_params=_CP,
    )(*args)
    if extra is None:
        return out[:M].reshape(*lead, Nout)
    o, e = out
    return o[:M].reshape(*lead, Nout), e[:M].reshape(*lead, e.shape[-1])


def pallas_linear_ln(x, w, b, gamma, beta, residual=None, eps=1e-5, out_dtype=jnp.float32):
    """LN((residual +) x @ w + b) fused in one kernel."""
    lead = x.shape[:-1]
    K = x.shape[-1]
    N = w.shape[-1]
    x2 = x.reshape(-1, K).astype(jnp.bfloat16)
    M = x2.shape[0]
    tm, Mp = _row_tile_and_pad(M)
    x2 = _pad_rows(x2, Mp)
    wb = w.astype(jnp.bfloat16)
    b2 = b.reshape(1, N).astype(jnp.float32)
    g2 = gamma.reshape(1, N).astype(jnp.float32)
    bb2 = beta.reshape(1, N).astype(jnp.float32)
    row_k = pl.BlockSpec((tm, K), lambda i: (i, 0))
    row_n = pl.BlockSpec((tm, N), lambda i: (i, 0))
    vec_n = pl.BlockSpec((1, N), lambda i: (0, 0))
    w_sp = pl.BlockSpec((K, N), lambda i: (0, 0))
    if residual is None:
        out = pl.pallas_call(
            functools.partial(_linear_ln_kernel, eps=eps),
            out_shape=jax.ShapeDtypeStruct((Mp, N), out_dtype),
            grid=(Mp // tm,),
            in_specs=[row_k, w_sp, vec_n, vec_n, vec_n],
            out_specs=row_n,
            compiler_params=_CP,
        )(x2, wb, b2, g2, bb2)
    else:
        r2 = _pad_rows(residual.reshape(-1, N).astype(jnp.float32), Mp)
        out = pl.pallas_call(
            functools.partial(_linear_ln_res_kernel, eps=eps),
            out_shape=jax.ShapeDtypeStruct((Mp, N), out_dtype),
            grid=(Mp // tm,),
            in_specs=[row_k, w_sp, vec_n, row_n, vec_n, vec_n],
            out_specs=row_n,
            compiler_params=_CP,
        )(x2, wb, b2, r2, g2, bb2)
    return out[:M].reshape(*lead, N)


def pallas_ffn_ln(x, w1, b1, w2, b2, gamma, beta, eps=1e-5):
    """LN(x + lin2(relu(lin1(x)))) in one kernel (x kept f32 for exact residual)."""
    lead = x.shape[:-1]
    E = x.shape[-1]
    F = w1.shape[-1]
    x2 = x.reshape(-1, E).astype(jnp.float32)
    M = x2.shape[0]
    tm, Mp = _row_tile_and_pad(M)
    x2 = _pad_rows(x2, Mp)
    out = pl.pallas_call(
        functools.partial(_ffn_ln_kernel, eps=eps),
        out_shape=jax.ShapeDtypeStruct((Mp, E), jnp.float32),
        grid=(Mp // tm,),
        in_specs=[
            pl.BlockSpec((tm, E), lambda i: (i, 0)),
            pl.BlockSpec((E, F), lambda i: (0, 0)),
            pl.BlockSpec((1, F), lambda i: (0, 0)),
            pl.BlockSpec((F, E), lambda i: (0, 0)),
            pl.BlockSpec((1, E), lambda i: (0, 0)),
            pl.BlockSpec((1, E), lambda i: (0, 0)),
            pl.BlockSpec((1, E), lambda i: (0, 0)),
        ],
        out_specs=pl.BlockSpec((tm, E), lambda i: (i, 0)),
        compiler_params=_CP,
    )(x2, w1.astype(jnp.bfloat16), b1.reshape(1, F).astype(jnp.float32),
      w2.astype(jnp.bfloat16), b2.reshape(1, E).astype(jnp.float32),
      gamma.reshape(1, E).astype(jnp.float32), beta.reshape(1, E).astype(jnp.float32))
    return out[:M].reshape(*lead, E)


def pallas_qkv_qpe(tgt, ref_points, qph_layers, sa):
    """query_pos_head MLP + fused QK projection + V projection in one pallas_call."""
    B, Nq, E = tgt.shape
    M = B * Nq
    tm, Mp = _row_tile_and_pad(M)
    t2 = _pad_rows(tgt.reshape(M, E).astype(jnp.float32), Mp)
    r2 = _pad_rows(ref_points.reshape(M, 4).astype(jnp.float32), Mp)
    w0, b0 = qph_layers[0]["w"], qph_layers[0]["b"]
    w1, b1 = qph_layers[1]["w"], qph_layers[1]["b"]
    H0 = w0.shape[1]

    def row(n):
        return pl.BlockSpec((tm, n), lambda i: (i, 0))

    def full(k, n):
        return pl.BlockSpec((k, n), lambda i: (0, 0))

    def vec(n):
        return pl.BlockSpec((1, n), lambda i: (0, 0))

    qk, v, qpe = pl.pallas_call(
        _qkv_qpe_kernel,
        out_shape=(jax.ShapeDtypeStruct((Mp, 2 * E), jnp.bfloat16),
                   jax.ShapeDtypeStruct((Mp, E), jnp.bfloat16),
                   jax.ShapeDtypeStruct((Mp, E), jnp.float32)),
        grid=(Mp // tm,),
        in_specs=[row(E), row(4),
                  full(4, H0), vec(H0), full(H0, E), vec(E),
                  full(E, 2 * E), vec(2 * E), full(E, E), vec(E)],
        out_specs=(row(2 * E), row(E), row(E)),
        compiler_params=_CP,
    )(t2, r2,
      w0.astype(jnp.bfloat16), b0.reshape(1, -1).astype(jnp.float32),
      w1.astype(jnp.bfloat16), b1.reshape(1, -1).astype(jnp.float32),
      sa["wqk"].astype(jnp.bfloat16), sa["bqk"].reshape(1, -1).astype(jnp.float32),
      sa["wv"].astype(jnp.bfloat16), sa["bv"].reshape(1, -1).astype(jnp.float32))
    qk = qk[:M].reshape(B, Nq, 2 * E)
    v = v[:M].reshape(B, Nq, E)
    qpe = qpe[:M].reshape(B, Nq, E)
    return qk[..., :E], qk[..., E:], v, qpe


def pallas_sdpa(q, k, v, num_heads):
    """Multi-head softmax(q k^T / sqrt(Dh)) v.  q, k, v, output: (B, Lq, E) bf16."""
    B, Lq, E = q.shape
    Dh = E // num_heads
    scale = 1.0 / float(np.sqrt(Dh))
    return pl.pallas_call(
        functools.partial(_sdpa_kernel, scale=scale, num_heads=num_heads, head_dim=Dh),
        out_shape=jax.ShapeDtypeStruct((B, Lq, E), jnp.bfloat16),
        grid=(B,),
        in_specs=[pl.BlockSpec((1, Lq, E), lambda i: (i, 0, 0))] * 3,
        out_specs=pl.BlockSpec((1, Lq, E), lambda i: (i, 0, 0)),
        compiler_params=_CP,
    )(q.astype(jnp.bfloat16), k.astype(jnp.bfloat16), v.astype(jnp.bfloat16))


# ------------------------------- JAX glue ----------------------------------

def inverse_sigmoid(x, eps=1e-5):
    out = jnp.clip(x, 0.0, 1.0)
    return jnp.log(jnp.clip(out, eps, None) / jnp.clip(1.0 - out, eps, None))


def generate_anchors(spatial_shapes, grid_size=0.05, eps=0.01, dtype=jnp.float32):
    anchors_list = []
    for i, (h, w) in enumerate(spatial_shapes):
        gy, gx = jnp.meshgrid(jnp.arange(h, dtype=dtype),
                              jnp.arange(w, dtype=dtype), indexing="ij")
        grid_xy = jnp.stack([gx, gy], -1)
        wh = jnp.array([w, h], dtype=dtype)
        grid_xy = (grid_xy + 0.5) / wh
        grid_wh = jnp.ones_like(grid_xy) * grid_size * (2.0 ** i)
        anchors_list.append(jnp.concatenate([grid_xy, grid_wh], -1).reshape(1, h * w, 4))
    anchors = jnp.concatenate(anchors_list, 1)
    valid_mask = jnp.all((anchors > eps) & (anchors < 1 - eps), -1, keepdims=True)
    anchors = jnp.log(anchors / (1.0 - anchors))
    anchors = jnp.where(valid_mask, anchors, jnp.inf)
    return anchors, valid_mask


def _grid_sample_bilinear_zeros(img, grid):
    """torch.grid_sample(mode='bilinear', padding_mode='zeros', align_corners=False)."""
    N, C, Hi, Wi = img.shape
    Hg, Wg = grid.shape[1], grid.shape[2]
    gx = grid[..., 0]
    gy = grid[..., 1]
    x = ((gx + 1.0) * Wi - 1.0) / 2.0
    y = ((gy + 1.0) * Hi - 1.0) / 2.0
    x0 = jnp.floor(x)
    y0 = jnp.floor(y)
    x1 = x0 + 1.0
    y1 = y0 + 1.0
    wx1 = x - x0
    wx0 = 1.0 - wx1
    wy1 = y - y0
    wy0 = 1.0 - wy1
    flat = img.reshape(N, C, Hi * Wi)

    # TODO(synk): this data-dependent bilinear gather stays in plain JAX.
    def sample(ix, iy):
        valid = (ix >= 0) & (ix <= Wi - 1) & (iy >= 0) & (iy <= Hi - 1)
        ixc = jnp.clip(ix, 0, Wi - 1).astype(jnp.int32)
        iyc = jnp.clip(iy, 0, Hi - 1).astype(jnp.int32)
        idx = (iyc * Wi + ixc).reshape(N, 1, Hg * Wg)
        idx = jnp.broadcast_to(idx, (N, C, Hg * Wg))
        g = jnp.take_along_axis(flat, idx, axis=2)
        return g * valid.reshape(N, 1, Hg * Wg).astype(img.dtype)

    out = (sample(x0, y0) * (wx0 * wy0).reshape(N, 1, -1)
           + sample(x1, y0) * (wx1 * wy0).reshape(N, 1, -1)
           + sample(x0, y1) * (wx0 * wy1).reshape(N, 1, -1)
           + sample(x1, y1) * (wx1 * wy1).reshape(N, 1, -1))
    return out.reshape(N, C, Hg, Wg)


def deformable_attention_core(value, spatial_shapes, sampling_locations, attention_weights):
    """value: (B, Lv, H, c) -> (B, Lq, H*c)."""
    bs, Lv, n_head, c = value.shape
    _, Lq, _, L, P, _ = sampling_locations.shape
    split = [h * w for h, w in spatial_shapes]
    offsets = np.cumsum([0] + split)
    sampling_grids = 2.0 * sampling_locations - 1.0
    out_list = []
    for lvl, (h, w) in enumerate(spatial_shapes):
        v_l = value[:, offsets[lvl]:offsets[lvl + 1]]
        v_l = v_l.transpose(0, 2, 3, 1).reshape(bs * n_head, c, h, w)
        grid_l = sampling_grids[:, :, :, lvl]
        grid_l = grid_l.transpose(0, 2, 1, 3, 4).reshape(bs * n_head, Lq, P, 2)
        out_list.append(_grid_sample_bilinear_zeros(v_l, grid_l))
    aw = attention_weights.transpose(0, 2, 1, 3, 4).reshape(bs * n_head, 1, Lq, L * P)
    sampled = jnp.stack(out_list, axis=-2).reshape(bs * n_head, c, Lq, L * P)
    out = (sampled * aw).sum(-1).reshape(bs, n_head * c, Lq)
    return out.transpose(0, 2, 1)


# ------------------------------- model blocks ------------------------------

def ms_deform_attn_core(cp, query, reference_points, value, spatial_shapes, cfg):
    """Multi-scale deformable attention up to (not including) the output projection."""
    H, L, P = cfg["num_heads"], cfg["num_levels"], cfg["num_decoder_points"]
    E = cfg["hidden_dim"]
    Dh = E // H
    B, Lq, _ = query.shape
    Lv = value.shape[1]
    HLP = H * L * P
    # fused sampling-offset + attention-weight projection (N = 3*H*L*P)
    proj = pallas_linear(query, cp["samp_attn"]["w"], cp["samp_attn"]["b"])
    so = proj[..., :2 * HLP].reshape(B, Lq, H, L, P, 2)
    aw = proj[..., 2 * HLP:].reshape(B, Lq, H, L * P)
    aw = jax.nn.softmax(aw, axis=-1).reshape(B, Lq, H, L, P)
    ref_cxcy = reference_points[:, :, None, :, None, :2]
    ref_wh = reference_points[:, :, None, :, None, 2:]
    samp_loc = ref_cxcy + so / P * ref_wh * 0.5
    v = pallas_linear(value, cp["val"]["w"], cp["val"]["b"],
                      out_dtype=jnp.bfloat16).reshape(B, Lv, H, Dh)
    return deformable_attention_core(v, spatial_shapes, samp_loc, aw)


def decoder_layer_forward(lp, qph_layers, tgt, ref_points_detach, ref_points_input,
                          memory, spatial_shapes, cfg):
    H = cfg["num_heads"]
    sa = lp["self_attn"]

    # --- self-attention: query_pos MLP + QK + V projections fused in one kernel
    q, k, v, qpe = pallas_qkv_qpe(tgt, ref_points_detach, qph_layers, sa)
    o = pallas_sdpa(q, k, v, H)                                   # (B, Lq, E) bf16
    # fused: out-projection + residual + LayerNorm1
    tgt = pallas_linear_ln(o, sa["wo"], sa["bo"], lp["norm1_g"], lp["norm1_b"], residual=tgt)

    # --- cross attention (multi-scale deformable) ---
    core = ms_deform_attn_core(lp["cross_attn"], tgt + qpe, ref_points_input,
                               memory, spatial_shapes, cfg)
    ca = lp["cross_attn"]
    # fused: output projection + residual + LayerNorm2
    tgt = pallas_linear_ln(core, ca["out"]["w"], ca["out"]["b"],
                           lp["norm2_g"], lp["norm2_b"], residual=tgt)

    # --- FFN (lin1 + ReLU + lin2 + residual + LayerNorm3, one kernel) ---
    tgt = pallas_ffn_ln(tgt, lp["lin1"]["w"], lp["lin1"]["b"],
                        lp["lin2"]["w"], lp["lin2"]["b"],
                        lp["norm3_g"], lp["norm3_b"])
    return tgt


def decoder_forward(params, tgt, ref_points_unact, memory, spatial_shapes, cfg):
    output = tgt
    ref_points_detach = jax.nn.sigmoid(ref_points_unact)
    num_layers = cfg["num_decoder_layers"]
    eval_idx = num_layers - 1
    dec_logits = dec_bboxes = None
    for i in range(num_layers):
        ref_points_input = ref_points_detach[:, :, None, :]
        output = decoder_layer_forward(params["dec_layers"][i], params["query_pos_head"],
                                       output, ref_points_detach, ref_points_input,
                                       memory, spatial_shapes, cfg)
        if i == eval_idx:
            sc = params["dec_score_head"][i]
            # fused bbox-head MLP + score head on the same row tile of `output`
            bbox_delta, dec_logits = pallas_mlp(params["dec_bbox_head"][i], output,
                                                extra=(sc["w"], sc["b"]))
            dec_bboxes = jax.nn.sigmoid(bbox_delta + inverse_sigmoid(ref_points_detach))
            break
        bbox_delta = pallas_mlp(params["dec_bbox_head"][i], output)
        ref_points_detach = jax.nn.sigmoid(bbox_delta + inverse_sigmoid(ref_points_detach))
    return dec_logits, dec_bboxes


def rtdetr_head_forward(params, feats, cfg):
    E = cfg["hidden_dim"]

    # --- encoder input: per-level 1x1 conv (+folded BN) as channels-last matmul;
    # folded BN bias is added in f32 inside the kernel; output kept bf16 (it is
    # only ever consumed as a bf16 matmul operand downstream).
    mem_parts = []
    spatial_shapes = []
    for l, feat in enumerate(feats):
        b, c, h, w = feat.shape
        x = jnp.transpose(feat, (0, 2, 3, 1)).reshape(b, h * w, c)   # NCHW -> tokens x channels
        p = params["input_proj"][l]
        mem_parts.append(pallas_linear(x, p["w"], p["b"], out_dtype=jnp.bfloat16))
        spatial_shapes.append((h, w))
    memory = jnp.concatenate(mem_parts, axis=1)                      # (B, Lv, E) bf16

    # --- decoder input selection ---
    anchors, valid_mask = generate_anchors(spatial_shapes)
    memory = valid_mask.astype(memory.dtype) * memory

    p = params["enc_output"]
    output_memory = pallas_linear_ln(memory, p["lin"]["w"], p["lin"]["b"],
                                     p["ln_g"], p["ln_b"], out_dtype=jnp.bfloat16)

    enc_outputs_class = pallas_linear(output_memory, params["enc_score"]["w"],
                                      params["enc_score"]["b"])
    enc_outputs_coord_unact = pallas_mlp(params["enc_bbox"], output_memory) + anchors

    # TODO(synk): top-k selection + gathers are data-dependent indexing; kept in plain JAX.
    scores = jnp.max(enc_outputs_class, axis=-1)
    _, topk_ind = jax.lax.top_k(scores, cfg["num_queries"])
    B, Nq = topk_ind.shape
    ref_points_unact = jnp.take_along_axis(
        enc_outputs_coord_unact, jnp.broadcast_to(topk_ind[..., None], (B, Nq, 4)), axis=1)
    target = jnp.take_along_axis(
        output_memory, jnp.broadcast_to(topk_ind[..., None], (B, Nq, E)), axis=1)
    target = target.astype(jnp.float32)

    # --- decoder ---
    out_logits, out_bboxes = decoder_forward(params, target, ref_points_unact, memory,
                                             spatial_shapes, cfg)
    return out_logits, out_bboxes


# ------------------------------ parameter init ------------------------------

class PRNG:
    def __init__(self, seed):
        self.key = jax.random.PRNGKey(seed)

    def next(self):
        self.key, sub = jax.random.split(self.key)
        return sub


def init_linear(rng, in_dim, out_dim, scale=0.05):
    return {"w": jax.random.normal(rng.next(), (in_dim, out_dim), jnp.float32) * scale,
            "b": jax.random.normal(rng.next(), (out_dim,), jnp.float32) * scale}


def init_mlp(rng, in_dim, hidden, out_dim, num_layers):
    h = [hidden] * (num_layers - 1)
    dims = list(zip([in_dim] + h, h + [out_dim]))
    return [init_linear(rng, a, b) for a, b in dims]


def build_params(cfg, rng):
    E = cfg["hidden_dim"]
    H, L, P = cfg["num_heads"], cfg["num_levels"], cfg["num_decoder_points"]
    HLP = H * L * P
    params = {}

    # input_proj: 1x1 conv (no bias) + BatchNorm2d folded into (w, b)
    params["input_proj"] = []
    for ch_in in cfg["in_channels"]:
        w = jax.random.normal(rng.next(), (E, ch_in), jnp.float32) * 0.05   # (out, in)
        gamma = 1.0 + 0.05 * jax.random.normal(rng.next(), (E,), jnp.float32)
        beta = 0.05 * jax.random.normal(rng.next(), (E,), jnp.float32)
        mean = 0.05 * jax.random.normal(rng.next(), (E,), jnp.float32)
        var = jnp.ones((E,), jnp.float32)
        scale = gamma / jnp.sqrt(var + 1e-5)
        params["input_proj"].append({"w": (w * scale[:, None]).T,            # (in, out)
                                     "b": beta - mean * scale})

    params["enc_output"] = {"lin": init_linear(rng, E, E),
                            "ln_g": jnp.ones((E,), jnp.float32),
                            "ln_b": jnp.zeros((E,), jnp.float32)}
    params["enc_score"] = init_linear(rng, E, cfg["num_classes"])
    params["enc_bbox"] = init_mlp(rng, E, E, 4, 3)
    params["query_pos_head"] = init_mlp(rng, 4, 2 * E, E, 2)

    params["dec_layers"] = []
    params["dec_score_head"] = []
    params["dec_bbox_head"] = []
    for _ in range(cfg["num_decoder_layers"]):
        qk = init_linear(rng, E, 2 * E)
        v = init_linear(rng, E, E)
        o = init_linear(rng, E, E)
        sa = {"wqk": qk["w"], "bqk": qk["b"],
              "wv": v["w"], "bv": v["b"],
              "wo": o["w"], "bo": o["b"]}
        layer = {
            "self_attn": sa,
            "norm1_g": jnp.ones((E,), jnp.float32), "norm1_b": jnp.zeros((E,), jnp.float32),
            "cross_attn": {
                "samp_attn": init_linear(rng, E, 3 * HLP),   # [2*HLP offsets | HLP weights]
                "val": init_linear(rng, E, E),
                "out": init_linear(rng, E, E),
            },
            "norm2_g": jnp.ones((E,), jnp.float32), "norm2_b": jnp.zeros((E,), jnp.float32),
            "lin1": init_linear(rng, E, 4 * E),
            "lin2": init_linear(rng, 4 * E, E),
            "norm3_g": jnp.ones((E,), jnp.float32), "norm3_b": jnp.zeros((E,), jnp.float32),
        }
        params["dec_layers"].append(layer)
        params["dec_score_head"].append(init_linear(rng, E, cfg["num_classes"]))
        params["dec_bbox_head"].append(init_mlp(rng, E, E, 4, 3))
    return params


# ----------------------------------- main -----------------------------------

if __name__ == "__main__":
    cfg = {
        "num_classes": 16,
        "hidden_dim": 32,
        "num_queries": 8,
        "in_channels": [16, 32, 64],
        "num_decoder_layers": 2,
        "num_heads": 4,
        "num_decoder_points": 4,
        "num_levels": 3,
    }
    B = 2

    key = jax.random.PRNGKey(0)
    k1, k2, k3 = jax.random.split(key, 3)
    feats = [
        jax.random.normal(k1, (B, 16, 8, 8), jnp.float32),
        jax.random.normal(k2, (B, 32, 4, 4), jnp.float32),
        jax.random.normal(k3, (B, 64, 2, 2), jnp.float32),
    ]

    params = build_params(cfg, PRNG(1))

    logits, bboxes = rtdetr_head_forward(params, feats, cfg)
    logits, bboxes = jax.block_until_ready((logits, bboxes))

    assert logits.shape == (B, cfg["num_queries"], cfg["num_classes"]), logits.shape
    assert bboxes.shape == (B, cfg["num_queries"], 4), bboxes.shape
    assert bool(jnp.all(jnp.isfinite(logits))) and bool(jnp.all(jnp.isfinite(bboxes)))
    print("KERNEL_OK")
</pallas_src>

<mosaic_0001>
module attributes {stable_mosaic.version = 11 : i64} {
  func.func @_linear_kernel(%arg0: i32, %arg1: memref<64x16xbf16, #tpu.memory_space<vmem>>, %arg2: memref<16x32xbf16, #tpu.memory_space<vmem>>, %arg3: memref<1x32xf32, #tpu.memory_space<vmem>>, %arg4: memref<64x32xbf16, #tpu.memory_space<vmem>>) attributes {dimension_semantics = [#tpu.dimension_semantics<parallel>], iteration_bounds = array<i64: 2>, scalar_prefetch = 0 : i64, scratch_operands = 0 : i64, tpu.core_type = #tpu.core_type<tc>, window_params = [{transform_indices = @transform_0, window_bounds = array<i64: 64, 16>}, {pipeline_mode = #tpu.pipeline_mode<synchronous>, transform_indices = @transform_1, window_bounds = array<i64: 16, 32>}, {pipeline_mode = #tpu.pipeline_mode<synchronous>, transform_indices = @transform_2, window_bounds = array<i64: 1, 32>}, {transform_indices = @transform_3, window_bounds = array<i64: 64, 32>}]} {
    %c0 = arith.constant 0 : index
    %c0_0 = arith.constant 0 : index
    %0 = vector.load %arg1[%c0, %c0_0] : memref<64x16xbf16, #tpu.memory_space<vmem>>, vector<64x16xbf16>
    %c0_1 = arith.constant 0 : index
    %c0_2 = arith.constant 0 : index
    %1 = vector.load %arg2[%c0_1, %c0_2] : memref<16x32xbf16, #tpu.memory_space<vmem>>, vector<16x32xbf16>
    %cst = arith.constant dense<0.000000e+00> : vector<64x32xf32>
    %2 = tpu.matmul %0, %1, %cst {dimension_numbers = #tpu.dot_dimension_numbers<[1], [0], [0], [1], [0, 0, 1, 1], [], []>} : vector<64x16xbf16>, vector<16x32xbf16>, vector<64x32xf32> -> vector<64x32xf32>
    %c0_3 = arith.constant 0 : index
    %c0_4 = arith.constant 0 : index
    %3 = vector.load %arg3[%c0_3, %c0_4] : memref<1x32xf32, #tpu.memory_space<vmem>>, vector<1x32xf32>
    %4 = vector.broadcast %3 : vector<1x32xf32> to vector<64x32xf32>
    %5 = arith.addf %2, %4 : vector<64x32xf32>
    %6 = arith.truncf %5 : vector<64x32xf32> to vector<64x32xbf16>
    %c0_5 = arith.constant 0 : index
    %c0_6 = arith.constant 0 : index
    %7 = vector.load %arg4[%c0_5, %c0_6] : memref<64x32xbf16, #tpu.memory_space<vmem>>, vector<64x32xbf16>
    tpu.vector_store %arg4[%c0_5, %c0_6], %6 {strides = array<i32>} : memref<64x32xbf16, #tpu.memory_space<vmem>>, vector<64x32xbf16>,
    return
  }
  func.func @transform_0(%arg0: i32) -> (i32, i32) {
    %c0_i32 = arith.constant 0 : i32
    %c0_i32_0 = arith.constant 0 : i32
    return %arg0, %c0_i32 : i32, i32
  }
  func.func @transform_1(%arg0: i32) -> (i32, i32) {
    %c0_i32 = arith.constant 0 : i32
    %c0_i32_0 = arith.constant 0 : i32
    %c0_i32_1 = arith.constant 0 : i32
    return %c0_i32, %c0_i32_0 : i32, i32
  }
  func.func @transform_2(%arg0: i32) -> (i32, i32) {
    %c0_i32 = arith.constant 0 : i32
    %c0_i32_0 = arith.constant 0 : i32
    %c0_i32_1 = arith.constant 0 : i32
    return %c0_i32, %c0_i32_0 : i32, i32
  }
  func.func @transform_3(%arg0: i32) -> (i32, i32) {
    %c0_i32 = arith.constant 0 : i32
    %c0_i32_0 = arith.constant 0 : i32
    return %arg0, %c0_i32 : i32, i32
  }
}

</mosaic_0001>

<bundles_post_ra>
// kernel: tpu_custom_call.1
= control target key start
LH: loop header
LB: loop body
LE: loop exit
PB: predicated region body
PF: predicated region fallthrough
CT: control target
= control target key end

     0   :  { %s410_s12 = smov 0   ;;  %s441_s0 = inlined_call_operand.vmem [shape: bf16[128,16], index: 0, kind: input, shape index: {}]   ;;  %s442_s1 = inlined_call_operand.vmem [shape: bf16[16,32], index: 1, kind: input, shape index: {}]   ;;  %s443_s2 = inlined_call_operand.vmem [shape: f32[1,32], index: 2, kind: input, shape index: {}]   ;;  %s444_s3 = inlined_call_operand.vmem [shape: bf16[128,32], index: 3, kind: output, shape index: {}]  }
   0x1 LB: > { %s330_s13 = sadd.s32 4294967295, %s388_s12   ;;  %p334_p0 = scmp.ge.s32.totalorder %s388_s12, 1  ;;  %s388_s12 = sphi %s410_s12, %s13_s12  }
   0x2   : > { %p138_p1 = scmp.lt.s32.totalorder %s388_s12, 3 }
   0x4   : > { %p139_p2 = pnand %p334_p0, %p138_p1 }
   0x5   : > { %s335_s16 = sshll.u32 (!%p139_p2), %s330_s13, 3 }
   0x6   : > { %142 = sbr.rel (%p139_p2) target bundleno = 162 (0xa2), region = 32  ;;  %p163_p3 = scmp.lt.s32.totalorder (!%p139_p2), %s335_s16, 15 }
   0xb   : > { %v369_v0 = vld [vmem:[%s442_s1] sm:$0xff]  ;;  %s446_s16 = smov (!%p163_p3, %s335_s16), 15  ;;  %vm215_vm0 = vcmask 130048   ;;  %vm265_vm1 = vcmask 257024  }
   0xc   : > { %235 = vmatpush.bf16.msra.mxu0 %v369_v0  ;;  %370 = vmatpush.bf16.msra.mxu1 %v369_v0  ;;  %s336_s17 = sshll.u32 %s446_s16, 2  ;;  %v381_v5 = vld [vmem:[%s443_s2] ss:$0 sm:$0xff] }
   0xd   : > { %371 = vmatpush.bf16.msra.mxu2 %v369_v0  ;;  %372 = vmatpush.bf16.msra.mxu3 %v369_v0  ;;  %s166_s20 = scalar_lea.vmem %s441_s0, %s336_s17  ;;  %s172_s25 = scalar_lea.vmem %s444_s3, %s336_s17 }
   0xe   : > { %v365_v1 = vld [vmem:[%s166_s20] sm:$0xff]  ;;  %v366_v2 = vld [vmem:[%s166_s20 + $0x8] sm:$0xff]  ;;  %v367_v3 = vld [vmem:[%s166_s20 + $0x10] sm:$0xff] }
   0xf   : > { %v368_v4 = vld [vmem:[%s166_s20 + $0x18] sm:$0xff]  ;;  %359 = vmatmul.msk.bf16.vlgmr.msra.gmra.mxu0 %vm215_vm0, %v365_v1  ;;  %360 = vmatmul.msk.bf16.vlgmr.msra.gmra.mxu1 %vm215_vm0, %v366_v2 }
  0x10   : > { %361 = vmatmul.msk.bf16.vlgmr.msra.gmra.mxu2 %vm215_vm0, %v367_v3  ;;  %362 = vmatmul.msk.bf16.vlgmr.msra.gmra.mxu3 %vm215_vm0, %v368_v4 }
  0x8c   : > { %v237_v6 = vpop.f32.mrf.mxu0  ;;  %v242_v7 = vpop.f32.mrf.mxu1 }
  0x8d   : > { %v238_v8 = vadd.f32 %v381_v5, %v237_v6  ;;  %v243_v9 = vadd.f32 %v381_v5, %v242_v7 }
  0x8f   : > { %v257_v10 = vpack.c.bf16 %v238_v8, %v238_v8  ;;  %v259_v11 = vpack.c.bf16 %v243_v9, %v243_v9 }
  0x91   : > { %266 = vst.msk [vmem:[%s172_s25] sm:$0xf] %vm265_vm1, %v257_v10 }
  0x92   : > { %268 = vst.msk [vmem:[%s172_s25 + $0x8] sm:$0xf] %vm265_vm1, %v259_v11 }
  0x93   : > { %v247_v12 = vpop.f32.mrf.mxu2  ;;  %v252_v13 = vpop.f32.mrf.mxu3 }
  0x94   : > { %v248_v14 = vadd.f32 %v381_v5, %v247_v12  ;;  %v253_v15 = vadd.f32 %v381_v5, %v252_v13  ;;  %v239_v16 = vpop.f32.mrf.mxu0  ;;  %v244_v17 = vpop.f32.mrf.mxu1 }
  0x95   : > { %v240_v18 = vadd.f32 %v381_v5, %v239_v16  ;;  %v245_v19 = vadd.f32 %v381_v5, %v244_v17 }
  0x96   : > { %v261_v20 = vpack.c.bf16 %v248_v14, %v248_v14  ;;  %v263_v21 = vpack.c.bf16 %v253_v15, %v253_v15 }
  0x97   : > { %v258_v22 = vpack.c.bf16 %v240_v18, %v240_v18  ;;  %v260_v23 = vpack.c.bf16 %v245_v19, %v245_v19 }
  0x98   : > { %270 = vst.msk [vmem:[%s172_s25 + $0x10] sm:$0xf] %vm265_vm1, %v261_v20 }
  0x99   : > { %272 = vst.msk [vmem:[%s172_s25 + $0x18] sm:$0xf] %vm265_vm1, %v263_v21 }
  0x9a   : > { %267 = vst.msk [vmem:[%s172_s25 + $0x4] sm:$0xf] %vm265_vm1, %v258_v22 }
  0x9b   : > { %269 = vst.msk [vmem:[%s172_s25 + $0xc] sm:$0xf] %vm265_vm1, %v260_v23  ;;  %v249_v24 = vpop.f32.mrf.mxu2  ;;  %v254_v25 = vpop.f32.mrf.mxu3 }
  0x9c   : > { %v250_v26 = vadd.f32 %v381_v5, %v249_v24  ;;  %v255_v27 = vadd.f32 %v381_v5, %v254_v25 }
  0x9e   : > { %v262_v28 = vpack.c.bf16 %v250_v26, %v250_v26  ;;  %v264_v29 = vpack.c.bf16 %v255_v27, %v255_v27 }
  0xa0   : > { %271 = vst.msk [vmem:[%s172_s25 + $0x14] sm:$0xf] %vm265_vm1, %v262_v28 }
  0xa1   : > { %273 = vst.msk [vmem:[%s172_s25 + $0x1c] sm:$0xf] %vm265_vm1, %v264_v29 }
  0xa2 PF: > { %s13_s12 = sadd.s32 1, %s388_s12  }
  0xa3   : > { %p10_p4 = scmp.ge.s32.totalorder %s13_s12, 4  }
  0xa5   :  { %12 = sbr.rel (!%p10_p4) target bundleno = 1 (0x1), region = 62 }

</bundles_post_ra>
